<compile_context>
chip_gen: v7x
topology: tpu7x:2x2x1
jax: 0.10.0
libtpu: 0.0.40
codegen_flags: <defaults>
</compile_context>

<pallas_src>
import jax
import jax.numpy as jnp
from jax.experimental import pallas as pl
from jax.experimental.pallas import tpu as pltpu

LANE = 128


def _round_up(x, m):
    return (x + m - 1) // m * m


def _pad_axis(a, axis, mult):
    size = a.shape[axis]
    pad = (-size) % mult
    if pad == 0:
        return a
    widths = [(0, 0)] * a.ndim
    widths[axis] = (0, pad)
    return jnp.pad(a, widths)


def expert_kernel(x_ref, w_fc_ref, b_fc_ref, w_ag_ref, b_ag_ref, o_ref, h_acc):
    # x_ref:    (tm, tk)         bf16  (K-tile of the token block)
    # w_fc_ref: (tk, d)          bf16  (K-tile of fc weight)
    # b_fc_ref: (1, d)           f32
    # w_ag_ref: (d, 2d)          bf16  (value | gate halves, each lane-padded)
    # b_ag_ref: (1, 2d)          f32
    # o_ref:    (tm, d)
    # h_acc:    (tm, d)          f32 accumulator for the first matmul
    k = pl.program_id(1)

    @pl.when(k == 0)
    def _():
        h_acc[...] = jnp.zeros_like(h_acc)

    # First matmul: bf16 operands, f32 accumulation on the MXU.
    h_acc[...] += jnp.dot(x_ref[...], w_fc_ref[...],
                          preferred_element_type=jnp.float32)

    @pl.when(k == pl.num_programs(1) - 1)
    def _():
        d = o_ref.shape[1]                        # static, multiple of 128
        h = h_acc[...] + b_fc_ref[...]            # f32 bias add
        h_mx = h.astype(w_ag_ref.dtype)           # bf16 only for the MXU feed
        # Single fused proj matmul (value & gate halves side-by-side).
        p = jnp.dot(h_mx, w_ag_ref[...],
                    preferred_element_type=jnp.float32) + b_ag_ref[...]
        a = p[:, :d]                              # 128-aligned split -> no copy
        g = p[:, d:]
        # SwiGLU: a * silu(g), all elementwise math in f32 (EUP sigmoid).
        o_ref[...] = (a * (g * jax.nn.sigmoid(g))).astype(o_ref.dtype)


def expert_forward(x, w_fc, b_fc, w_proj, b_proj, *, tm=256, tk=512,
                   matmul_dtype=jnp.bfloat16):
    """x: [..., dim_in] -> [..., dim_out]. Weights are [in, out] (= W^T of torch)."""
    dim_in = x.shape[-1]
    dim_out = w_fc.shape[1]
    assert w_proj.shape == (dim_out, 2 * dim_out)
    lead = x.shape[:-1]

    x2d = x.reshape(-1, dim_in)
    n = x2d.shape[0]

    # Split proj into value / gate halves, pad each half's lane dim to 128,
    # then re-concatenate -> in-kernel split is exactly lane-tile aligned.
    w_a, w_g = w_proj[:, :dim_out], w_proj[:, dim_out:]
    b_a, b_g = b_proj[:dim_out], b_proj[dim_out:]

    # Row tile: default 256, but don't pad tiny token counts all the way up.
    tm_eff = min(tm, _round_up(n, 8))

    # Zero-pad to lane/sublane friendly shapes. Zero padding is exact for matmuls.
    x_p = _pad_axis(_pad_axis(x2d, 1, LANE), 0, tm_eff)
    w_fc_p = _pad_axis(_pad_axis(w_fc, 0, LANE), 1, LANE)
    w_a_p = _pad_axis(_pad_axis(w_a, 0, LANE), 1, LANE)
    w_g_p = _pad_axis(_pad_axis(w_g, 0, LANE), 1, LANE)
    w_ag_p = jnp.concatenate([w_a_p, w_g_p], axis=1)
    b_fc_p = _pad_axis(b_fc.reshape(1, -1).astype(jnp.float32), 1, LANE)
    b_a_p = _pad_axis(b_a.reshape(1, -1).astype(jnp.float32), 1, LANE)
    b_g_p = _pad_axis(b_g.reshape(1, -1).astype(jnp.float32), 1, LANE)
    b_ag_p = jnp.concatenate([b_a_p, b_g_p], axis=1)

    n_p, k_p = x_p.shape
    d_p = w_fc_p.shape[1]

    # K tile for the first matmul: largest multiple of 128 <= tk dividing k_p.
    tk_eff = min(_round_up(tk, LANE), k_p)
    while k_p % tk_eff:
        tk_eff -= LANE

    # bf16 operands for the MXU; biases stay f32.
    x_bf = x_p.astype(matmul_dtype)
    w_fc_bf = w_fc_p.astype(matmul_dtype)
    w_ag_bf = w_ag_p.astype(matmul_dtype)

    grid = (n_p // tm_eff, k_p // tk_eff)

    def _resident(shape):
        # Block index never changes across the grid: keep one VMEM copy only.
        return pl.BlockSpec(shape, lambda i, k: (0, 0),
                            pipeline_mode=pl.Buffered(1))

    itemsize = jnp.dtype(x.dtype).itemsize
    cost = pl.CostEstimate(
        flops=int(2 * n * dim_in * dim_out + 4 * n * dim_out * dim_out),
        transcendentals=int(n * dim_out),
        bytes_accessed=int(n_p * k_p * 2                      # x (bf16)
                           + (k_p * d_p + 2 * d_p * d_p) * 2  # weights (bf16)
                           + 3 * d_p * 4                      # biases (f32)
                           + n_p * d_p * itemsize),           # output
    )

    out = pl.pallas_call(
        expert_kernel,
        out_shape=jax.ShapeDtypeStruct((n_p, d_p), x.dtype),
        grid_spec=pltpu.PrefetchScalarGridSpec(
            num_scalar_prefetch=0,
            grid=grid,
            in_specs=[
                pl.BlockSpec((tm_eff, tk_eff), lambda i, k: (i, k)),   # x
                pl.BlockSpec((tk_eff, d_p), lambda i, k: (k, 0)),      # w_fc
                _resident((1, d_p)),                                   # b_fc
                _resident((d_p, 2 * d_p)),                             # w_ag
                _resident((1, 2 * d_p)),                               # b_ag
            ],
            out_specs=pl.BlockSpec((tm_eff, d_p), lambda i, k: (i, 0)),
            scratch_shapes=[pltpu.VMEM((tm_eff, d_p), jnp.float32)],
        ),
        compiler_params=pltpu.CompilerParams(
            dimension_semantics=("parallel", "arbitrary"),
            vmem_limit_bytes=48 << 20,
        ),
        cost_estimate=cost,
    )(x_bf, w_fc_bf, b_fc_p, w_ag_bf, b_ag_p)

    return out[:n, :dim_out].reshape(*lead, dim_out)


def expert_ref(x, w_fc, b_fc, w_proj, b_proj, mxu_dtype=jnp.float32):
    """Pure-JAX reference; mxu_dtype mirrors the kernel's matmul operand dtype."""
    h = jnp.dot(x.astype(mxu_dtype), w_fc.astype(mxu_dtype),
                preferred_element_type=jnp.float32) + b_fc
    p = jnp.dot(h.astype(mxu_dtype), w_proj.astype(mxu_dtype),
                preferred_element_type=jnp.float32) + b_proj
    a, g = jnp.split(p, 2, axis=-1)
    return a * (g * jax.nn.sigmoid(g))


if __name__ == "__main__":
    # Small shapes consistent with the module: batch=2, seq=8, dim_in=32, dim_out=64.
    batch, seq, dim_in, dim_out = 2, 8, 32, 64

    key = jax.random.PRNGKey(0)
    k_x, k_w1, k_b1, k_w2, k_b2 = jax.random.split(key, 5)

    x = jax.random.normal(k_x, (batch, seq, dim_in), dtype=jnp.float32)
    # Deterministic synthetic parameters (stored as [in, out], i.e. W^T of PyTorch).
    w_fc = jax.random.normal(k_w1, (dim_in, dim_out), jnp.float32) * (1.0 / dim_in ** 0.5)
    b_fc = jax.random.normal(k_b1, (dim_out,), jnp.float32) * 0.01
    w_proj = jax.random.normal(k_w2, (dim_out, 2 * dim_out), jnp.float32) * (1.0 / dim_out ** 0.5)
    b_proj = jax.random.normal(k_b2, (2 * dim_out,), jnp.float32) * 0.01

    out = jax.block_until_ready(expert_forward(x, w_fc, b_fc, w_proj, b_proj))

    ref_bf16 = expert_ref(x, w_fc, b_fc, w_proj, b_proj, mxu_dtype=jnp.bfloat16)
    ref_f32 = expert_ref(x, w_fc, b_fc, w_proj, b_proj, mxu_dtype=jnp.float32)

    assert out.shape == (batch, seq, dim_out)
    assert bool(jnp.all(jnp.isfinite(out)))
    # Tight check vs a reference that mirrors the kernel's bf16 MXU operands.
    assert jnp.allclose(out, ref_bf16, atol=5e-3, rtol=5e-3)
    # Loose sanity check vs the full-f32 reference.
    assert jnp.allclose(out, ref_f32, atol=5e-2, rtol=5e-2)

    print("KERNEL_OK")
</pallas_src>

<mosaic_0001>
module attributes {stable_mosaic.version = 11 : i64} {
  func.func @expert_kernel(%arg0: i32, %arg1: i32, %arg2: memref<16x128xbf16, #tpu.memory_space<vmem>>, %arg3: memref<128x128xbf16, #tpu.memory_space<vmem>>, %arg4: memref<1x128xf32, #tpu.memory_space<vmem>>, %arg5: memref<128x256xbf16, #tpu.memory_space<vmem>>, %arg6: memref<1x256xf32, #tpu.memory_space<vmem>>, %arg7: memref<16x128xf32, #tpu.memory_space<vmem>>, %arg8: memref<16x128xf32, #tpu.memory_space<vmem>>) attributes {dimension_semantics = [#tpu.dimension_semantics<parallel>, #tpu.dimension_semantics<arbitrary>], iteration_bounds = array<i64: 1, 1>, scalar_prefetch = 0 : i64, scratch_operands = 1 : i64, tpu.core_type = #tpu.core_type<tc>, window_params = [{transform_indices = @transform_0, window_bounds = array<i64: 16, 128>}, {transform_indices = @transform_1, window_bounds = array<i64: 128, 128>}, {pipeline_mode = #tpu.pipeline_mode<synchronous>, transform_indices = @transform_2, window_bounds = array<i64: 1, 128>}, {pipeline_mode = #tpu.pipeline_mode<synchronous>, transform_indices = @transform_3, window_bounds = array<i64: 128, 256>}, {pipeline_mode = #tpu.pipeline_mode<synchronous>, transform_indices = @transform_4, window_bounds = array<i64: 1, 256>}, {transform_indices = @transform_5, window_bounds = array<i64: 16, 128>}]} {
    %c0_i32 = arith.constant 0 : i32
    %0 = arith.cmpi eq, %arg1, %c0_i32 : i32
    %1 = arith.extui %0 : i1 to i32
    %c0_i32_0 = arith.constant 0 : i32
    %2 = arith.cmpi ne, %1, %c0_i32_0 : i32
    scf.if %2 {
      %cst_10 = arith.constant 0.000000e+00 : f32
      %12 = vector.broadcast %cst_10 : f32 to vector<16x128xf32>
      %c0_11 = arith.constant 0 : index
      %c0_12 = arith.constant 0 : index
      %13 = vector.load %arg8[%c0_11, %c0_12] : memref<16x128xf32, #tpu.memory_space<vmem>>, vector<16x128xf32>
      tpu.vector_store %arg8[%c0_11, %c0_12], %12 {strides = array<i32>} : memref<16x128xf32, #tpu.memory_space<vmem>>, vector<16x128xf32>,
    } else {
    }
    %c0 = arith.constant 0 : index
    %c0_1 = arith.constant 0 : index
    %3 = vector.load %arg8[%c0, %c0_1] : memref<16x128xf32, #tpu.memory_space<vmem>>, vector<16x128xf32>
    %c0_2 = arith.constant 0 : index
    %c0_3 = arith.constant 0 : index
    %4 = vector.load %arg2[%c0_2, %c0_3] : memref<16x128xbf16, #tpu.memory_space<vmem>>, vector<16x128xbf16>
    %c0_4 = arith.constant 0 : index
    %c0_5 = arith.constant 0 : index
    %5 = vector.load %arg3[%c0_4, %c0_5] : memref<128x128xbf16, #tpu.memory_space<vmem>>, vector<128x128xbf16>
    %cst = arith.constant dense<0.000000e+00> : vector<16x128xf32>
    %6 = tpu.matmul %4, %5, %cst {dimension_numbers = #tpu.dot_dimension_numbers<[1], [0], [0], [1], [0, 0, 1, 1], [], []>} : vector<16x128xbf16>, vector<128x128xbf16>, vector<16x128xf32> -> vector<16x128xf32>
    %7 = arith.addf %3, %6 : vector<16x128xf32>
    %c0_6 = arith.constant 0 : index
    %c0_7 = arith.constant 0 : index
    %8 = vector.load %arg8[%c0_6, %c0_7] : memref<16x128xf32, #tpu.memory_space<vmem>>, vector<16x128xf32>
    tpu.vector_store %arg8[%c0_6, %c0_7], %7 {strides = array<i32>} : memref<16x128xf32, #tpu.memory_space<vmem>>, vector<16x128xf32>,
    %c0_i32_8 = arith.constant 0 : i32
    %9 = arith.cmpi eq, %arg1, %c0_i32_8 : i32
    %10 = arith.extui %9 : i1 to i32
    %c0_i32_9 = arith.constant 0 : i32
    %11 = arith.cmpi ne, %10, %c0_i32_9 : i32
    scf.if %11 {
      %c0_10 = arith.constant 0 : index
      %c0_11 = arith.constant 0 : index
      %12 = vector.load %arg8[%c0_10, %c0_11] : memref<16x128xf32, #tpu.memory_space<vmem>>, vector<16x128xf32>
      %c0_12 = arith.constant 0 : index
      %c0_13 = arith.constant 0 : index
      %13 = vector.load %arg4[%c0_12, %c0_13] : memref<1x128xf32, #tpu.memory_space<vmem>>, vector<1x128xf32>
      %14 = vector.broadcast %13 : vector<1x128xf32> to vector<16x128xf32>
      %15 = arith.addf %12, %14 : vector<16x128xf32>
      %16 = arith.truncf %15 : vector<16x128xf32> to vector<16x128xbf16>
      %c0_14 = arith.constant 0 : index
      %c0_15 = arith.constant 0 : index
      %17 = vector.load %arg5[%c0_14, %c0_15] : memref<128x256xbf16, #tpu.memory_space<vmem>>, vector<128x256xbf16>
      %cst_16 = arith.constant dense<0.000000e+00> : vector<16x256xf32>
      %18 = tpu.matmul %16, %17, %cst_16 {dimension_numbers = #tpu.dot_dimension_numbers<[1], [0], [0], [1], [0, 0, 1, 1], [], []>} : vector<16x128xbf16>, vector<128x256xbf16>, vector<16x256xf32> -> vector<16x256xf32>
      %c0_17 = arith.constant 0 : index
      %c0_18 = arith.constant 0 : index
      %19 = vector.load %arg6[%c0_17, %c0_18] : memref<1x256xf32, #tpu.memory_space<vmem>>, vector<1x256xf32>
      %20 = vector.broadcast %19 : vector<1x256xf32> to vector<16x256xf32>
      %21 = arith.addf %18, %20 : vector<16x256xf32>
      %22 = vector.extract_strided_slice %21 {offsets = [0, 0], sizes = [16, 128], strides = [1, 1]} : vector<16x256xf32> to vector<16x128xf32>
      %23 = vector.extract_strided_slice %21 {offsets = [0, 128], sizes = [16, 128], strides = [1, 1]} : vector<16x256xf32> to vector<16x128xf32>
      %24 = arith.negf %23 : vector<16x128xf32>
      %25 = math.exp %24 : vector<16x128xf32>
      %cst_19 = arith.constant 1.000000e+00 : f32
      %26 = vector.broadcast %cst_19 : f32 to vector<16x128xf32>
      %27 = arith.addf %26, %25 : vector<16x128xf32>
      %28 = arith.divf %26, %27 : vector<16x128xf32>
      %29 = arith.mulf %23, %28 : vector<16x128xf32>
      %30 = arith.mulf %22, %29 : vector<16x128xf32>
      %c0_20 = arith.constant 0 : index
      %c0_21 = arith.constant 0 : index
      %31 = vector.load %arg7[%c0_20, %c0_21] : memref<16x128xf32, #tpu.memory_space<vmem>>, vector<16x128xf32>
      tpu.vector_store %arg7[%c0_20, %c0_21], %30 {strides = array<i32>} : memref<16x128xf32, #tpu.memory_space<vmem>>, vector<16x128xf32>,
    } else {
    }
    return
  }
  func.func @transform_0(%arg0: i32, %arg1: i32) -> (i32, i32) {
    %c0_i32 = arith.constant 0 : i32
    return %arg0, %arg1 : i32, i32
  }
  func.func @transform_1(%arg0: i32, %arg1: i32) -> (i32, i32) {
    %c0_i32 = arith.constant 0 : i32
    %c0_i32_0 = arith.constant 0 : i32
    return %arg1, %c0_i32 : i32, i32
  }
  func.func @transform_2(%arg0: i32, %arg1: i32) -> (i32, i32) {
    %c0_i32 = arith.constant 0 : i32
    %c0_i32_0 = arith.constant 0 : i32
    %c0_i32_1 = arith.constant 0 : i32
    return %c0_i32, %c0_i32_0 : i32, i32
  }
  func.func @transform_3(%arg0: i32, %arg1: i32) -> (i32, i32) {
    %c0_i32 = arith.constant 0 : i32
    %c0_i32_0 = arith.constant 0 : i32
    %c0_i32_1 = arith.constant 0 : i32
    return %c0_i32, %c0_i32_0 : i32, i32
  }
  func.func @transform_4(%arg0: i32, %arg1: i32) -> (i32, i32) {
    %c0_i32 = arith.constant 0 : i32
    %c0_i32_0 = arith.constant 0 : i32
    %c0_i32_1 = arith.constant 0 : i32
    return %c0_i32, %c0_i32_0 : i32, i32
  }
  func.func @transform_5(%arg0: i32, %arg1: i32) -> (i32, i32) {
    %c0_i32 = arith.constant 0 : i32
    %c0_i32_0 = arith.constant 0 : i32
    return %arg0, %c0_i32 : i32, i32
  }
}

</mosaic_0001>

<bundles_post_ra>
// kernel: tpu_custom_call.1
= control target key start
LH: loop header
LB: loop body
LE: loop exit
PB: predicated region body
PF: predicated region fallthrough
CT: control target
= control target key end

     0   :  { %10 = vsyncpa [#allocation4], 0  ;;  %s701_s0 = inlined_call_operand.hbm [shape: bf16[16,128], index: 0, kind: input, shape index: {}]   ;;  %s702_s1 = inlined_call_operand.hbm [shape: bf16[128,128], index: 1, kind: input, shape index: {}]   ;;  %s703_s2 = inlined_call_operand.vmem [shape: f32[1,128], index: 2, kind: input, shape index: {}]   ;;  %s704_s3 = inlined_call_operand.hbm [shape: bf16[128,256], index: 3, kind: input, shape index: {}]   ;;  %s705_s4 = inlined_call_operand.vmem [shape: f32[1,256], index: 4, kind: input, shape index: {}]   ;;  %s706_s5 = inlined_call_operand.hbm [shape: f32[16,128], index: 5, kind: output, shape index: {}]  }
   0x1   :  { %11 = vsyncpa [#allocation7], 0 }
   0x2   :  { %12 = vsyncpa [#allocation5], 0  ;;  %s593_s18 = smov [#allocation6]   ;;  %s594_s20 = smov [#allocation3]  }
   0x3   :  { %s30_s19 = sshll.u32 %s593_s18, 4  ;;  %s18_s21 = sshll.u32 %s594_s20, 4  ;;  %s31_s19 = int_to_ptr.vmem [resolvable:$true] %s30_s19  ;;  %s634_s21 = int_to_ptr.vmem [resolvable:$true] %s18_s21 }
   0x4   :  { %s499_s24 = scalar_lea.hbm %s702_s1, 1024 }
   0x5   :  { %p500_p0 = scmp.ne.s32.totalorder %s702_s1, %s499_s24  ;;  %p503_p1 = scmp.lt.u32.totalorder %s499_s24, %s702_s1 }
   0x7   :  { %p505_p2 = pnand %p503_p1, %p500_p0 }
   0x9   :  { %508 = shalt.err (!%p505_p2)
}
   0xa   :  { %s509_s29 = scalar_lea.vmem %s31_s19, 1024  ;;  %p514_p4 = scmp.lt.s32.totalorder %s31_s19, %s31_s19 }
   0xb   :  { %p510_p3 = scmp.ne.s32.totalorder %s31_s19, %s509_s29  ;;  %p515_p5 = scmp.lt.s32.totalorder %s509_s29, %s509_s29 }
   0xd   :  { %p516_p6 = por %p515_p5, %p514_p4 }
   0xf   :  { %p517_p7 = pnand %p516_p6, %p510_p3 }
  0x11   :  { %520 = shalt.err (!%p517_p7)
}
  0x12   :  { %s595_s30 = smov 64   ;;  %s596_s6 = smov 4  }
  0x13   :  { %36 = dma.hbm_to_vmem [thread:$0]  %s702_s1, 1024, %s31_s19, [#allocation7], %s595_s30, %s595_s30, %s596_s6  }
  0x14   :  { %s521_s11 = scalar_lea.hbm %s701_s0, 128 }
  0x15   :  { %p522_p8 = scmp.ne.s32.totalorder %s701_s0, %s521_s11  ;;  %p525_p9 = scmp.lt.u32.totalorder %s521_s11, %s701_s0 }
  0x17   :  { %p527_p10 = pnand %p525_p9, %p522_p8 }
  0x19   :  { %530 = shalt.err (!%p527_p10)
}
  0x1a   :  { %s531_s16 = scalar_lea.vmem %s634_s21, 128  ;;  %p536_p12 = scmp.lt.s32.totalorder %s634_s21, %s634_s21 }
  0x1b   :  { %p532_p11 = scmp.ne.s32.totalorder %s634_s21, %s531_s16  ;;  %p537_p13 = scmp.lt.s32.totalorder %s531_s16, %s531_s16 }
  0x1d   :  { %p538_p0 = por %p537_p13, %p536_p12 }
  0x1f   :  { %p539_p1 = pnand %p538_p0, %p532_p11 }
  0x21   :  { %542 = shalt.err (!%p539_p1)
}
  0x22   :  { %24 = dma.hbm_to_vmem [thread:$0]  %s701_s0, 128, %s634_s21, [#allocation4], %s595_s30, %s595_s30, %s596_s6  }
  0x23   :  { %s597_s18 = smov [#allocation8]   ;;  %s543_s23 = scalar_lea.hbm %s704_s3, 2048 }
  0x24   :  { %s44_s19 = sshll.u32 %s597_s18, 4  ;;  %p544_p2 = scmp.ne.s32.totalorder %s704_s3, %s543_s23  ;;  %s45_s19 = int_to_ptr.vmem [resolvable:$true] %s44_s19 }
  0x25   :  { %p547_p3 = scmp.lt.u32.totalorder %s543_s23, %s704_s3 }
  0x27   :  { %p549_p4 = pnand %p547_p3, %p544_p2 }
  0x29   :  { %552 = shalt.err (!%p549_p4)
}
  0x2a   :  { %s553_s28 = scalar_lea.vmem %s45_s19, 2048  ;;  %p558_p6 = scmp.lt.s32.totalorder %s45_s19, %s45_s19 }
  0x2b   :  { %p554_p5 = scmp.ne.s32.totalorder %s45_s19, %s553_s28  ;;  %p559_p7 = scmp.lt.s32.totalorder %s553_s28, %s553_s28 }
  0x2d   :  { %p560_p8 = por %p559_p7, %p558_p6 }
  0x2f   :  { %p561_p9 = pnand %p560_p8, %p554_p5 }
  0x31   :  { %564 = shalt.err (!%p561_p9)
}
  0x32   :  { %s598_s0 = smov 128   ;;  %s599_s21 = smov 8  }
  0x33   :  { %50 = dma.hbm_to_vmem [thread:$0]  %s704_s3, 2048, %s45_s19, [#allocation7], %s598_s0, %s598_s0, %s599_s21  }
  0x34   :  { %587 = dma.done.wait [#allocation4], 128  }
  0x35   :  { %588 = vsyncadd [#allocation4], 4294967168 }
  0x36   :  { %589 = dma.done.wait [#allocation7], 3072  }
  0x37   :  { %590 = vsyncadd [#allocation7], 4294964224  ;;  %v600_v0 = vmov 0.0   ;;  %vm601_vm0 = vmmov 0   ;;  %v458_v1 = vld [vmem:[#allocation6] sm:$0xff]   ;;  %v459_v2 = vld [vmem:[#allocation6 + $0x8] sm:$0xff]   ;;  %v221_v35 = vlaneseq }
  0x38   :  { %427 = vmatprep.subr.bf16.mxu0 %v600_v0  ;;  %443 = vmatprep.mubr.msk.bf16.mxu0 %vm601_vm0, %v600_v0  ;;  %v460_v3 = vld [vmem:[#allocation6 + $0x10] sm:$0xff]   ;;  %v461_v4 = vld [vmem:[#allocation6 + $0x18] sm:$0xff]   ;;  %v467_v5 = vld [vmem:[#allocation8 + $0x4] ss:$8 sps:$4 sm:$0xff]   ;;  %v602_v26 = vmov 0  }
  0x39   :  { %428 = vmatpush3.bf16.msra.mxu0 %v458_v1  ;;  %v469_v6 = vld [vmem:[#allocation8] ss:$8 sps:$4 sm:$0xff]   ;;  %311 = vmatprep.subr.bf16.mxu1 %v467_v5  ;;  %v470_v7 = vld [vmem:[#allocation8 + $0x14] ss:$8 sps:$4 sm:$0xff]   ;;  %v472_v8 = vld [vmem:[#allocation8 + $0x10] ss:$8 sps:$4 sm:$0xff]  }
  0x3a   :  { %429 = vmatprep.subr.bf16.mxu0 %v600_v0  ;;  %312 = vmatpush1.bf16.msra.mxu1 %v469_v6  ;;  %v473_v9 = vld [vmem:[#allocation8 + $0x24] ss:$8 sps:$4 sm:$0xff]   ;;  %v475_v11 = vld [vmem:[#allocation8 + $0x20] ss:$8 sps:$4 sm:$0xff]   ;;  %v476_v12 = vld [vmem:[#allocation8 + $0x34] ss:$8 sps:$4 sm:$0xff]  }
  0x3b   :  { %313 = vmatprep.subr.bf16.mxu1 %v470_v7  ;;  %v462_v10 = vld [vmem:[#allocation6 + $0x20] sm:$0xff]   ;;  %v463_v13 = vld [vmem:[#allocation6 + $0x28] sm:$0xff]   ;;  %v478_v14 = vld [vmem:[#allocation8 + $0x30] ss:$8 sps:$4 sm:$0xff]   ;;  %343 = vmatprep.mubr.bf16.mxu1 %v602_v26  ;;  %v222_v36 = vshrl.u32 %v221_v35, 7 }
  0x3c   :  { %v479_v15 = vld [vmem:[#allocation8 + $0x44] ss:$8 sps:$4 sm:$0xff]   ;;  %v464_v16 = vld [vmem:[#allocation6 + $0x30] sm:$0xff]   ;;  %v481_v17 = vld [vmem:[#allocation8 + $0x40] ss:$8 sps:$4 sm:$0xff]  }
  0x3d   :  { %430 = vmatpush3.bf16.msra.mxu0 %v459_v2  ;;  %v482_v18 = vld [vmem:[#allocation8 + $0x54] ss:$8 sps:$4 sm:$0xff]   ;;  %v484_v20 = vld [vmem:[#allocation8 + $0x50] ss:$8 sps:$4 sm:$0xff]   ;;  %v485_v22 = vld [vmem:[#allocation8 + $0x64] ss:$8 sps:$4 sm:$0xff]  }
  0x3e   :  { %431 = vmatprep.subr.bf16.mxu0 %v600_v0  ;;  %314 = vmatpush1.bf16.msra.mxu1 %v472_v8  ;;  %v465_v19 = vld [vmem:[#allocation6 + $0x38] sm:$0xff]   ;;  %v487_v23 = vld [vmem:[#allocation8 + $0x60] ss:$8 sps:$4 sm:$0xff]   ;;  %v227_v37 = vsub.s32 1, %v222_v36  ;;  %v223_v52 = vsub.s32 0, %v222_v36 }
  0x3f   :  { %315 = vmatprep.subr.bf16.mxu1 %v473_v9  ;;  %v466_v21 = vld [vmem:[#allocation3] sm:$0xff]  }
  0x40   :  { %v488_v24 = vld [vmem:[#allocation8 + $0x74] ss:$8 sps:$4 sm:$0xff]   ;;  %v490_v25 = vld [vmem:[#allocation8 + $0x70] ss:$8 sps:$4 sm:$0xff]  }
  0x41   :  { %432 = vmatpush3.bf16.msra.mxu0 %v460_v3  ;;  %v399_v28 = vld [vmem:[%s703_s2] ss:$0 sm:$0xff]  ;;  %s603_s2 = smov [#allocation9]  }
  0x42   :  { %433 = vmatprep.subr.bf16.mxu0 %v600_v0  ;;  %316 = vmatpush1.bf16.msra.mxu1 %v475_v11  ;;  %v219_v38 = vld [vmem:[%s705_s4] sm:$0x3]  ;;  %s377_s4 = sshll.u32 %s603_s2, 4  ;;  %s378_s4 = int_to_ptr.vmem [resolvable:$true] %s377_s4 }
  0x43   :  { %317 = vmatprep.subr.bf16.mxu1 %v476_v12  ;;  %v228_v39 = vrot.slane %v219_v38, %v227_v37  ;;  %v224_v53 = vrot.slane %v219_v38, %v223_v52  ;;  %s565_s9 = scalar_lea.vmem %s378_s4, 256  ;;  %p570_p11 = scmp.lt.s32.totalorder %s378_s4, %s378_s4 }
  0x44   :  { %p566_p10 = scmp.ne.s32.totalorder %s378_s4, %s565_s9  ;;  %p571_p12 = scmp.lt.s32.totalorder %s565_s9, %s565_s9 }
  0x45   :  { %434 = vmatpush3.bf16.msra.mxu0 %v461_v4 }
  0x46   :  { %435 = vmatprep.subr.bf16.mxu0 %v600_v0  ;;  %318 = vmatpush1.bf16.msra.mxu1 %v478_v14  ;;  %p572_p13 = por %p571_p12, %p570_p11 }
  0x47   :  { %319 = vmatprep.subr.bf16.mxu1 %v479_v15 }
  0x48   :  { %p573_p0 = pnand %p572_p13, %p566_p10 }
  0x49   :  { %436 = vmatpush3.bf16.msra.mxu0 %v462_v10 }
  0x4a   :  { %437 = vmatprep.subr.bf16.mxu0 %v600_v0  ;;  %320 = vmatpush1.bf16.msra.mxu1 %v481_v17 }
  0x4b   :  { %321 = vmatprep.subr.bf16.mxu1 %v482_v18 }
  0x4d   :  { %438 = vmatpush3.bf16.msra.mxu0 %v463_v13 }
  0x4e   :  { %439 = vmatprep.subr.bf16.mxu0 %v600_v0  ;;  %322 = vmatpush1.bf16.msra.mxu1 %v484_v20 }
  0x4f   :  { %323 = vmatprep.subr.bf16.mxu1 %v485_v22 }
  0x51   :  { %440 = vmatpush3.bf16.msra.mxu0 %v464_v16 }
  0x52   :  { %441 = vmatprep.subr.bf16.mxu0 %v600_v0  ;;  %324 = vmatpush1.bf16.msra.mxu1 %v487_v23 }
  0x53   :  { %325 = vmatprep.subr.bf16.mxu1 %v488_v24 }
  0x55   :  { %442 = vmatpush3.bf16.msra.mxu0 %v465_v19 }
  0x56   :  { %326 = vmatpush1.bf16.msra.mxu1 %v490_v25 }
  0x58   :  { %444 = vmatmul.mubr.bf16.vlgmr.msra.gmra.mrb[0].mxu0 %v466_v21 }
 0x12b   :  { %v177_v27 = vpop.f32.mrb[0].mxu0 }
 0x12c   :  { %v445_v29 = vpop.f32.mrb[1].mxu0  ;;  %v200_v31 = vadd.f32 %v399_v28, %v177_v27 }
 0x12d   :  { %v180_v30 = vpop.f32.mrb[2].mxu0 }
 0x12e   :  { %v201_v32 = vadd.f32 %v399_v28, %v180_v30  ;;  %v446_v33 = vpop.f32.mrb[3].mxu0 }
 0x130   :  { %v202_v34 = vpack.c.bf16 %v201_v32, %v200_v31 }
 0x132   :  { %344 = vmatmul.mubr.bf16.vlgmr.msra.gmra.mrb[0].mxu1 %v202_v34 }
 0x205   :  { %v345_v40 = vpop.f32.mrb[0].mxu1 }
 0x206   :  { %v347_v41 = vpop.f32.mrb[1].mxu1  ;;  %v346_v55 = vadd.f32 %v345_v40, %v224_v53 }
 0x207   :  { %v348_v42 = vadd.f32 %v347_v41, %v228_v39  ;;  %v349_v43 = vpop.f32.mrb[2].mxu1 }
 0x208   :  { %v351_v44 = vpop.f32.mrb[3].mxu1  ;;  %v350_v59 = vadd.f32 %v349_v43, %v224_v53 }
 0x209   :  { %v416_v45 = vmul.f32 -1.442695, %v348_v42  ;;  %v352_v46 = vadd.f32 %v351_v44, %v228_v39 }
 0x20b   :  { %491 = vpow2.f32 %v416_v45  ;;  %v417_v47 = vmul.f32 -1.442695, %v352_v46 }
 0x20d   :  { %493 = vpow2.f32 %v417_v47 }
 0x215   :  { %v492_v48 = vpop.eup %491 }
 0x216   :  { %v360_v49 = vadd.f32 1.0, %v492_v48 }
 0x217   :  { %v494_v50 = vpop.eup %493 }
 0x218   :  { %495 = vrcp.f32 %v360_v49  ;;  %v361_v51 = vadd.f32 1.0, %v494_v50 }
 0x21a   :  { %497 = vrcp.f32 %v361_v51 }
 0x222   :  { %v496_v54 = vpop.eup %495 }
 0x223   :  { %v366_v56 = vmul.f32 %v496_v54, %v348_v42 }
 0x224   :  { %v498_v57 = vpop.eup %497 }
 0x225   :  { %v368_v58 = vmul.f32 %v366_v56, %v346_v55  ;;  %v367_v60 = vmul.f32 %v498_v57, %v352_v46 }
 0x227   :  { %370 = vst [vmem:[#allocation9] sm:$0xff] %v368_v58  ;;  %v369_v61 = vmul.f32 %v367_v60, %v350_v59 }
 0x229   :  { %371 = vst [vmem:[#allocation9 + $0x8] sm:$0xff] %v369_v61 }
 0x22a   :  { %576 = shalt.err (!%p573_p0)
}
 0x22b   :  { %s577_s12 = scalar_lea.hbm %s706_s5, 256 }
 0x22c   :  { %p578_p1 = scmp.ne.s32.totalorder %s706_s5, %s577_s12  ;;  %p581_p2 = scmp.lt.u32.totalorder %s577_s12, %s706_s5 }
 0x22e   :  { %p583_p3 = pnand %p581_p2, %p578_p1 }
 0x230   :  { %586 = shalt.err (!%p583_p3)
}
 0x231   :  { %383 = dma.vmem_to_hbm [thread:$0]  %s378_s4, 256, %s706_s5, [#allocation5], %s598_s0, %s598_s0, %s599_s21  }
 0x232   :  { %591 = dma.done.wait [#allocation5], 256  }
 0x233   :  { %592 = vsyncadd [#allocation5], 4294967040 }
 0x234   :  { %387 = vsyncpa [#allocation4], 1 }
 0x235   :  { %388 = vsyncpa [#allocation7], 1 }
 0x236   :  { %389 = vsyncpa [#allocation5], 1 }

</bundles_post_ra>
